<compile_context>
chip_gen: v7x
topology: tpu7x:2x2x1
jax: 0.10.0
libtpu: 0.0.40
codegen_flags: <defaults>
</compile_context>

<pallas_src>
import functools

import jax
import jax.numpy as jnp
from jax.experimental import pallas as pl
from jax.experimental.pallas import tpu as pltpu


# ----------------------------------------------------------------------------
# helpers
# ----------------------------------------------------------------------------
def _round_up(x, m):
    return ((x + m - 1) // m) * m


def _choose_row_tile(n_rows, d, max_tile=512, block_budget_bytes=4 * 1024 * 1024):
    """Largest row tile (multiple of 8) whose (tile, d) f32 block fits budget."""
    t = block_budget_bytes // (4 * max(int(d), 1))
    t = max(8, min(int(max_tile), int(t)))
    t = (t // 8) * 8
    n8 = _round_up(int(n_rows), 8)
    if n8 <= t:
        return n8                      # a single tile covers everything
    if t >= 128:
        t = (t // 128) * 128           # MXU/lane-friendly when actually tiling
    return t


def _pad_rows(x, n_pad):
    n = x.shape[0]
    if n == n_pad:
        return x
    return jnp.pad(x, ((0, n_pad - n),) + ((0, 0),) * (x.ndim - 1))


_VMEM_LIMIT = 40 * 1024 * 1024


# ----------------------------------------------------------------------------
# linear MMD:  delta = mean(source, 0) - mean(target, 0);  loss = delta . delta
# streamed over row tiles of the stacked + weighted inputs.
# ----------------------------------------------------------------------------
def _linear_mmd_kernel(x_ref, w_ref, out_ref, acc_ref):
    i = pl.program_id(0)

    @pl.when(i == 0)
    def _():
        acc_ref[...] = jnp.zeros_like(acc_ref)

    x = x_ref[...].astype(jnp.float32)                      # (TR, d)
    w = w_ref[...].astype(jnp.float32)                      # (TR, 1)
    acc_ref[...] += jnp.sum(x * w, axis=0, keepdims=True)   # (1, d)

    @pl.when(i == pl.num_programs(0) - 1)
    def _():
        delta = acc_ref[...]
        out_ref[...] = jnp.sum(delta * delta, keepdims=True)  # (1, 1)


def _linear_mmd(source, target, *, max_tile=512):
    n, d = source.shape
    m, d2 = target.shape
    assert d == d2
    total = jnp.concatenate(
        [source.astype(jnp.float32), target.astype(jnp.float32)], axis=0)
    w = jnp.concatenate(
        [jnp.full((n, 1), 1.0 / n, jnp.float32),
         jnp.full((m, 1), -1.0 / m, jnp.float32)], axis=0)

    tile = _choose_row_tile(n + m, d, max_tile=max_tile)
    n_pad = _round_up(n + m, tile)
    total = _pad_rows(total, n_pad)          # zero rows
    w = _pad_rows(w, n_pad)                  # zero weights -> no contribution

    out = pl.pallas_call(
        _linear_mmd_kernel,
        out_shape=jax.ShapeDtypeStruct((1, 1), jnp.float32),
        grid=(n_pad // tile,),
        in_specs=[
            pl.BlockSpec((tile, d), lambda i: (i, 0)),
            pl.BlockSpec((tile, 1), lambda i: (i, 0)),
        ],
        out_specs=pl.BlockSpec((1, 1), lambda i: (0, 0)),
        scratch_shapes=[pltpu.VMEM((1, d), jnp.float32)],
        compiler_params=pltpu.CompilerParams(
            dimension_semantics=("arbitrary",),
            vmem_limit_bytes=_VMEM_LIMIT),
    )(total, w)
    return out[0, 0]


# ----------------------------------------------------------------------------
# rbf MMD, pass 1: row statistics for the data-driven bandwidth
# ----------------------------------------------------------------------------
def _row_stats_kernel(x_ref, colsum_ref, sqsum_ref):
    i = pl.program_id(0)

    @pl.when(i == 0)
    def _():
        colsum_ref[...] = jnp.zeros_like(colsum_ref)
        sqsum_ref[...] = jnp.zeros_like(sqsum_ref)

    x = x_ref[...].astype(jnp.float32)
    colsum_ref[...] += jnp.sum(x, axis=0, keepdims=True)    # (1, d)
    sqsum_ref[...] += jnp.sum(x * x, keepdims=True)         # (1, 1)


# ----------------------------------------------------------------------------
# rbf MMD, pass 2: tiled Gram-matrix kernel sums with weighted accumulation
# ----------------------------------------------------------------------------
def _rbf_pairwise_kernel(xi_ref, xj_ref, wi_ref, wj_ref, nib_ref, out_ref, *,
                         kernel_num):
    j = pl.program_id(1)

    @pl.when(j == 0)
    def _():
        out_ref[...] = jnp.zeros_like(out_ref)

    xi = xi_ref[...].astype(jnp.float32)                    # (TI, d)
    xj = xj_ref[...].astype(jnp.float32)                    # (TJ, d)

    # Squared distances via the Gram identity, Gram block on the MXU.
    contract_last = (((1,), (1,)), ((), ()))
    gram = jax.lax.dot_general(xi, xj, contract_last,
                               preferred_element_type=jnp.float32)  # (TI, TJ)
    rn_i = jnp.sum(xi * xi, axis=1, keepdims=True)                  # (TI, 1)
    ones_row = jnp.ones((1, xi.shape[1]), jnp.float32)
    rn_j = jax.lax.dot_general(ones_row, xj * xj, contract_last,
                               preferred_element_type=jnp.float32)  # (1, TJ)
    l2 = jnp.maximum(rn_i + rn_j - 2.0 * gram, 0.0)                 # clamp FP noise

    # Sum of the multi-bandwidth Gaussian kernels; -1/bw_k is a precomputed
    # SMEM scalar so the EUP only runs the exp passes (no per-element divide).
    ksum = jnp.zeros_like(l2)
    for k in range(kernel_num):                                     # static unroll
        ksum = ksum + jnp.exp(l2 * nib_ref[k])

    wj = wj_ref[...].astype(jnp.float32)                            # (TJ, 1)
    row = jnp.dot(ksum, wj, preferred_element_type=jnp.float32)     # (TI, 1) MXU
    out_ref[...] += wi_ref[...].astype(jnp.float32) * row


def _rbf_mmd(source, target, kernel_mul, kernel_num, fix_sigma, *, max_tile=512):
    n, d = source.shape
    m, d2 = target.shape
    assert d == d2
    n_samples = n + m

    total = jnp.concatenate(
        [source.astype(jnp.float32), target.astype(jnp.float32)], axis=0)
    # w = [+1/n ..., -1/m ...] so that  loss = w^T K w = XX + YY - XY - YX.
    w = jnp.concatenate(
        [jnp.full((n, 1), 1.0 / n, jnp.float32),
         jnp.full((m, 1), -1.0 / m, jnp.float32)], axis=0)

    tile = _choose_row_tile(n_samples, d, max_tile=max_tile)
    n_pad = _round_up(n_samples, tile)
    total_p = _pad_rows(total, n_pad)        # zero rows
    w_p = _pad_rows(w, n_pad)                # zero weights
    n_tiles = n_pad // tile

    # ---- pass 1: bandwidth -------------------------------------------------
    # sum_{i,j} |x_i - x_j|^2 = 2*N*sum_i |x_i|^2 - 2*|sum_i x_i|^2
    # (zero padding rows contribute nothing to either statistic).
    if fix_sigma:   # mirrors the PyTorch truthiness check
        bandwidth = jnp.float32(fix_sigma)
    else:
        colsum, sqsum = pl.pallas_call(
            _row_stats_kernel,
            out_shape=(jax.ShapeDtypeStruct((1, d), jnp.float32),
                       jax.ShapeDtypeStruct((1, 1), jnp.float32)),
            grid=(n_tiles,),
            in_specs=[pl.BlockSpec((tile, d), lambda i: (i, 0))],
            out_specs=(pl.BlockSpec((1, d), lambda i: (0, 0)),
                       pl.BlockSpec((1, 1), lambda i: (0, 0))),
            compiler_params=pltpu.CompilerParams(
                dimension_semantics=("arbitrary",),
                vmem_limit_bytes=_VMEM_LIMIT),
        )(total_p)
        sum_l2 = 2.0 * n_samples * sqsum[0, 0] - 2.0 * jnp.sum(colsum * colsum)
        # NOTE: if all samples are identical this is 0/0 (NaN), exactly like
        # the PyTorch reference.
        bandwidth = sum_l2 / jnp.float32(n_samples * n_samples - n_samples)

    bandwidth = bandwidth / jnp.float32(kernel_mul ** (kernel_num // 2))
    neg_inv_bw = jnp.stack(
        [-1.0 / (bandwidth * jnp.float32(kernel_mul ** i))
         for i in range(kernel_num)]).astype(jnp.float32)           # (kernel_num,)

    # ---- pass 2: tiled weighted kernel sum ----------------------------------
    kernel = functools.partial(_rbf_pairwise_kernel, kernel_num=kernel_num)
    partial_rows = pl.pallas_call(
        kernel,
        out_shape=jax.ShapeDtypeStruct((n_pad, 1), jnp.float32),
        grid=(n_tiles, n_tiles),
        in_specs=[
            pl.BlockSpec((tile, d), lambda i, j: (i, 0)),          # x rows (i tile)
            pl.BlockSpec((tile, d), lambda i, j: (j, 0)),          # x rows (j tile)
            pl.BlockSpec((tile, 1), lambda i, j: (i, 0)),          # w (i tile)
            pl.BlockSpec((tile, 1), lambda i, j: (j, 0)),          # w (j tile)
            pl.BlockSpec(memory_space=pltpu.MemorySpace.SMEM),     # -1/bw_k scalars
        ],
        out_specs=pl.BlockSpec((tile, 1), lambda i, j: (i, 0)),
        compiler_params=pltpu.CompilerParams(
            dimension_semantics=("parallel", "arbitrary"),
            vmem_limit_bytes=_VMEM_LIMIT),
    )(total_p, total_p, w_p, w_p, neg_inv_bw)

    return jnp.sum(partial_rows)


# ----------------------------------------------------------------------------
# Module-equivalent wrapper
# ----------------------------------------------------------------------------
class MMDLoss:
    def __init__(self, kernel_type='linear', kernel_mul=2.0, kernel_num=5,
                 fix_sigma=None, **kwargs):
        self.kernel_num = kernel_num
        self.kernel_mul = kernel_mul
        self.fix_sigma = None   # matches PyTorch __init__ (fix_sigma arg ignored)
        self.kernel_type = kernel_type

    def __call__(self, source, target):
        if self.kernel_type == 'linear':
            return _linear_mmd(source, target)
        elif self.kernel_type == 'rbf':
            return _rbf_mmd(source, target, self.kernel_mul,
                            self.kernel_num, self.fix_sigma)
        else:
            raise ValueError(f"unknown kernel_type: {self.kernel_type}")


# ----------------------------------------------------------------------------
# Pure-JAX references for verification
# ----------------------------------------------------------------------------
def _ref_linear(source, target):
    delta = (jnp.mean(source.astype(jnp.float32), 0)
             - jnp.mean(target.astype(jnp.float32), 0))
    return jnp.sum(delta * delta)


def _ref_rbf(source, target, kernel_mul=2.0, kernel_num=5, fix_sigma=None):
    n = source.shape[0]
    total = jnp.concatenate([source, target], axis=0).astype(jnp.float32)
    N = total.shape[0]
    l2 = jnp.sum((total[None, :, :] - total[:, None, :]) ** 2, axis=2)
    if fix_sigma:
        bw = jnp.float32(fix_sigma)
    else:
        bw = jnp.sum(l2) / (N * N - N)
    bw = bw / (kernel_mul ** (kernel_num // 2))
    kern = sum(jnp.exp(-l2 / (bw * kernel_mul ** i)) for i in range(kernel_num))
    xx = jnp.mean(kern[:n, :n])
    yy = jnp.mean(kern[n:, n:])
    xy = jnp.mean(kern[:n, n:])
    yx = jnp.mean(kern[n:, :n])
    return xx + yy - xy - yx


if __name__ == "__main__":
    key = jax.random.PRNGKey(0)
    k1, k2, k3 = jax.random.split(key, 3)

    n, m, d = 8, 8, 32
    source = jax.random.normal(k1, (n, d), dtype=jnp.float32)
    target = jax.random.normal(k2, (m, d), dtype=jnp.float32) + 0.5

    # Tolerances account for the MXU-based Gram computation (f32 matmul may use
    # reduced-precision passes) vs. the pure-VPU pairwise-diff reference.
    rtol, atol = 2e-3, 1e-3

    # default path: linear
    linear_loss = jax.block_until_ready(MMDLoss(kernel_type='linear')(source, target))
    assert jnp.allclose(linear_loss, _ref_linear(source, target),
                        rtol=rtol, atol=atol), (linear_loss,
                                                _ref_linear(source, target))

    # rbf path
    rbf_loss = jax.block_until_ready(MMDLoss(kernel_type='rbf')(source, target))
    assert jnp.allclose(rbf_loss, _ref_rbf(source, target),
                        rtol=rtol, atol=atol), (rbf_loss, _ref_rbf(source, target))

    # ragged (n != m) case with forced small tiles: exercises zero-padding with
    # zero weights and the multi-tile init/accumulate/finalize grid paths.
    n2, m2 = 8, 12
    target2 = jax.random.normal(k3, (m2, d), dtype=jnp.float32) + 0.25

    lin2 = jax.block_until_ready(_linear_mmd(source, target2, max_tile=8))
    assert jnp.allclose(lin2, _ref_linear(source, target2),
                        rtol=rtol, atol=atol), (lin2, _ref_linear(source, target2))

    rbf2 = jax.block_until_ready(
        _rbf_mmd(source, target2, kernel_mul=2.0, kernel_num=5,
                 fix_sigma=None, max_tile=16))
    assert jnp.allclose(rbf2, _ref_rbf(source, target2),
                        rtol=rtol, atol=atol), (rbf2, _ref_rbf(source, target2))

    print("KERNEL_OK")
</pallas_src>

<mosaic_0001>
module attributes {stable_mosaic.version = 11 : i64} {
  func.func @_linear_mmd_kernel(%arg0: i32, %arg1: memref<16x32xf32, #tpu.memory_space<vmem>>, %arg2: memref<16x1xf32, #tpu.memory_space<vmem>>, %arg3: memref<1x1xf32, #tpu.memory_space<vmem>>, %arg4: memref<1x32xf32, #tpu.memory_space<vmem>>) attributes {dimension_semantics = [#tpu.dimension_semantics<arbitrary>], iteration_bounds = array<i64: 1>, scalar_prefetch = 0 : i64, scratch_operands = 1 : i64, tpu.core_type = #tpu.core_type<tc>, window_params = [{transform_indices = @transform_0, window_bounds = array<i64: 16, 32>}, {transform_indices = @transform_1, window_bounds = array<i64: 16, 1>}, {pipeline_mode = #tpu.pipeline_mode<synchronous>, transform_indices = @transform_2, window_bounds = array<i64: 1, 1>}]} {
    %c0_i32 = arith.constant 0 : i32
    %0 = arith.cmpi eq, %arg0, %c0_i32 : i32
    %1 = arith.extui %0 : i1 to i32
    %c0_i32_0 = arith.constant 0 : i32
    %2 = arith.cmpi ne, %1, %c0_i32_0 : i32
    scf.if %2 {
      %cst_10 = arith.constant 0.000000e+00 : f32
      %15 = vector.broadcast %cst_10 : f32 to vector<1x32xf32>
      %c0_11 = arith.constant 0 : index
      %c0_12 = arith.constant 0 : index
      %16 = vector.load %arg4[%c0_11, %c0_12] : memref<1x32xf32, #tpu.memory_space<vmem>>, vector<1x32xf32>
      tpu.vector_store %arg4[%c0_11, %c0_12], %15 {strides = array<i32>} : memref<1x32xf32, #tpu.memory_space<vmem>>, vector<1x32xf32>,
    } else {
    }
    %c0 = arith.constant 0 : index
    %c0_1 = arith.constant 0 : index
    %3 = vector.load %arg1[%c0, %c0_1] : memref<16x32xf32, #tpu.memory_space<vmem>>, vector<16x32xf32>
    %c0_2 = arith.constant 0 : index
    %c0_3 = arith.constant 0 : index
    %4 = vector.load %arg2[%c0_2, %c0_3] : memref<16x1xf32, #tpu.memory_space<vmem>>, vector<16x1xf32>
    %c0_4 = arith.constant 0 : index
    %c0_5 = arith.constant 0 : index
    %5 = vector.load %arg4[%c0_4, %c0_5] : memref<1x32xf32, #tpu.memory_space<vmem>>, vector<1x32xf32>
    %6 = vector.broadcast %4 : vector<16x1xf32> to vector<16x32xf32>
    %7 = arith.mulf %3, %6 : vector<16x32xf32>
    %cst = arith.constant dense<0.000000e+00> : vector<32xf32>
    %8 = vector.multi_reduction <add>, %7, %cst [0] : vector<16x32xf32> to vector<32xf32>
    %9 = vector.shape_cast %8 : vector<32xf32> to vector<1x32xf32>
    %10 = arith.addf %5, %9 : vector<1x32xf32>
    %c0_6 = arith.constant 0 : index
    %c0_7 = arith.constant 0 : index
    %11 = vector.load %arg4[%c0_6, %c0_7] : memref<1x32xf32, #tpu.memory_space<vmem>>, vector<1x32xf32>
    tpu.vector_store %arg4[%c0_6, %c0_7], %10 {strides = array<i32>} : memref<1x32xf32, #tpu.memory_space<vmem>>, vector<1x32xf32>,
    %c0_i32_8 = arith.constant 0 : i32
    %12 = arith.cmpi eq, %arg0, %c0_i32_8 : i32
    %13 = arith.extui %12 : i1 to i32
    %c0_i32_9 = arith.constant 0 : i32
    %14 = arith.cmpi ne, %13, %c0_i32_9 : i32
    scf.if %14 {
      %c0_10 = arith.constant 0 : index
      %c0_11 = arith.constant 0 : index
      %15 = vector.load %arg4[%c0_10, %c0_11] : memref<1x32xf32, #tpu.memory_space<vmem>>, vector<1x32xf32>
      %16 = arith.mulf %15, %15 : vector<1x32xf32>
      %17 = vector.shape_cast %16 : vector<1x32xf32> to vector<1x1x32xf32>
      %cst_12 = arith.constant dense<0.000000e+00> : vector<1xf32>
      %18 = vector.multi_reduction <add>, %17, %cst_12 [1, 2] : vector<1x1x32xf32> to vector<1xf32>
      %19 = vector.shape_cast %18 : vector<1xf32> to vector<1x1x1xf32>
      %20 = vector.extract %19[0, 0, 0] : f32 from vector<1x1x1xf32>
      %21 = vector.broadcast %20 : f32 to vector<1x1xf32>
      %c0_13 = arith.constant 0 : index
      %c0_14 = arith.constant 0 : index
      %22 = vector.load %arg3[%c0_13, %c0_14] : memref<1x1xf32, #tpu.memory_space<vmem>>, vector<1x1xf32>
      tpu.vector_store %arg3[%c0_13, %c0_14], %21 {strides = array<i32>} : memref<1x1xf32, #tpu.memory_space<vmem>>, vector<1x1xf32>,
    } else {
    }
    return
  }
  func.func @transform_0(%arg0: i32) -> (i32, i32) {
    %c0_i32 = arith.constant 0 : i32
    %c0_i32_0 = arith.constant 0 : i32
    return %arg0, %c0_i32 : i32, i32
  }
  func.func @transform_1(%arg0: i32) -> (i32, i32) {
    %c0_i32 = arith.constant 0 : i32
    %c0_i32_0 = arith.constant 0 : i32
    return %arg0, %c0_i32 : i32, i32
  }
  func.func @transform_2(%arg0: i32) -> (i32, i32) {
    %c0_i32 = arith.constant 0 : i32
    %c0_i32_0 = arith.constant 0 : i32
    %c0_i32_1 = arith.constant 0 : i32
    return %c0_i32, %c0_i32_0 : i32, i32
  }
}

</mosaic_0001>

<bundles_post_ra>
// kernel: tpu_custom_call.1
= control target key start
LH: loop header
LB: loop body
LE: loop exit
PB: predicated region body
PF: predicated region fallthrough
CT: control target
= control target key end

     0   :  { %s155_s0 = inlined_call_operand.vmem [shape: f32[16,32], index: 0, kind: input, shape index: {}]   ;;  %s156_s1 = inlined_call_operand.vmem [shape: f32[16,1], index: 1, kind: input, shape index: {}]   ;;  %s157_s2 = inlined_call_operand.hbm [shape: f32[1,1], index: 2, kind: output, shape index: {}]  }
   0x1   :  { %v20_v0 = vld [vmem:[%s156_s1] sm:$0xff] }
   0x2   :  { %7 = vsyncpa [#allocation4], 0  ;;  %v110_v1 = vmov 0   ;;  %v21_v2 = vld [vmem:[%s156_s1 + $0x8] sm:$0xff]  ;;  %vm16_vm0 = vcmask 253952   ;;  %v111_v3 = vmov 0.0  }
   0x3   :  { %85 = vset.pattern.permute.xlu0 %v110_v1  ;;  %17 = vst.msk [vmem:[#allocation2] sm:$0x1] %vm16_vm0, %v111_v3  ;;  %v18_v5 = vld [vmem:[%s155_s0] sm:$0xff]  ;;  %v19_v6 = vld [vmem:[%s155_s0 + $0x8] sm:$0xff]  ;;  %vm35_vm1 = vcmask 261120   ;;  %s112_s0 = smov [#allocation3]  }
   0x4   :  { %25 = vperm.xlu0 %85, %v20_v0   ;;  %s72_s1 = sshll.u32 %s112_s0, 4  ;;  %vm64_vm2 = vcmask 0   ;;  %s73_s1 = int_to_ptr.vmem [resolvable:$true] %s72_s1 }
   0x5   :  { %s86_s18 = scalar_lea.vmem %s73_s1, 16  ;;  %s90_s19 = scalar_lea.vmem %s73_s1, 32 }
   0x6   :  { %p87_p0 = scmp.ne.s32.totalorder %s73_s1, %s86_s18  ;;  %p91_p1 = scmp.lt.s32.totalorder %s73_s1, %s73_s1 }
   0x7   :  { %p92_p2 = scmp.lt.s32.totalorder %s90_s19, %s86_s18 }
   0x8   :  { %30 = vperm.xlu0 %85, %v21_v2  }
   0x9   :  { %p93_p3 = por %p92_p2, %p91_p1 }
   0xa   :  { %v22_v18 = vld [vmem:[#allocation2] sm:$0x1] }
   0xb   :  { %p94_p4 = pnand %p93_p3, %p87_p0 }
  0x83   :  { %v26_v4 = vpop.permute.xlu0 %25 }
  0x84   :  { %v33_v7 = vmul.f32 %v26_v4, %v18_v5 }
  0x86   :  { %v36_v10 = vsel %vm35_vm1, %v33_v7, 0.0 }
  0x87   :  { %v31_v8 = vpop.permute.xlu0 %30 }
  0x88   :  { %v34_v9 = vmul.f32 %v31_v8, %v19_v6 }
  0x8a   :  { %v37_v11 = vsel %vm35_vm1, %v34_v9, 0.0 }
  0x8b   :  { %v38_v12 = vadd.f32 %v37_v11, %v36_v10 }
  0x8d   :  { %v39_v13 = vrot.slane %v38_v12, 4 }
  0x8f   :  { %v40_v14 = vadd.f32 %v39_v13, %v38_v12 }
  0x91   :  { %v41_v15 = vrot.slane %v40_v14, 2 }
  0x93   :  { %v42_v16 = vadd.f32 %v41_v15, %v40_v14 }
  0x95   :  { %v43_v17 = vrot.slane %v42_v16, 1 }
  0x97   :  { %v44_v19 = vadd.f32 %v43_v17, %v42_v16 }
  0x99   :  { %v45_v20 = vadd.f32 %v44_v19, %v22_v18 }
  0x9b   :  { %47 = vst.msk [vmem:[#allocation2] sm:$0x1] %vm16_vm0, %v45_v20 }
  0xa2   :  { %v51_v21 = vld [vmem:[#allocation2] sm:$0x1] }
  0xa3   :  { %v52_v22 = vmul.f32 %v51_v21, %v51_v21 }
  0xa5   :  { %v53_v23 = vsel %vm16_vm0, %v52_v22, 0.0 }
  0xa6   :  { %54 = vadd.xlane.f32.xlu1 %v53_v23 }
 0x133   :  { %v55_v24 = vpop.xlane.xlu1 %54 }
 0x134   :  { %v56_v25 = vrot.slane %v55_v24, 4 }
 0x136   :  { %v57_v26 = vadd.f32 %v56_v25, %v55_v24 }
 0x138   :  { %v58_v27 = vrot.slane %v57_v26, 2 }
 0x13a   :  { %v59_v28 = vadd.f32 %v58_v27, %v57_v26 }
 0x13c   :  { %v60_v29 = vrot.slane %v59_v28, 1 }
 0x13e   :  { %v61_v30 = vadd.f32 %v60_v29, %v59_v28 }
 0x140   :  { %80 = vpush %v61_v30 }
 0x171   :  { %s81_s17 = spop %80 }
 0x172   :  { %v63_v31 = vstv %s81_s17 }
 0x173   :  { %65 = vst.msk [vmem:[#allocation3] sm:$0x1] %vm64_vm2, %v63_v31 }
 0x174   :  { %97 = shalt.err (!%p94_p4)
}
 0x175   :  { %s98_s22 = scalar_lea.hbm %s157_s2, 16 }
 0x176   :  { %p99_p5 = scmp.ne.s32.totalorder %s157_s2, %s98_s22  ;;  %p102_p6 = scmp.lt.u32.totalorder %s98_s22, %s157_s2 }
 0x178   :  { %p104_p7 = pnand %p102_p6, %p99_p5 }
 0x17a   :  { %107 = shalt.err (!%p104_p7)
}
 0x17b   :  { %75 = dma.vmem_to_hbm [thread:$0]  %s73_s1, 16, %s157_s2, [#allocation4]  }
 0x17c   :  { %108 = dma.done.wait [#allocation4], 16  }
 0x17d   :  { %109 = vsyncadd [#allocation4], 4294967280 }
 0x17e   :  { %79 = vsyncpa [#allocation4], 1 }

</bundles_post_ra>
